<compile_context>
chip_gen: v6e
topology: v6e:2x2x1
jax: 0.10.0
libtpu: 0.0.40
codegen_flags: <defaults>
</compile_context>

<pallas_src>
import functools

import jax
import jax.numpy as jnp
from jax.experimental import pallas as pl
from jax.experimental.pallas import tpu as pltpu


def _alpha_loss_kernel(logits_ref, labels_ref, out_ref, *, alpha, n_valid, tile_n):
    # logits_ref: (TILE_N, C) float (any float dtype) in VMEM
    # labels_ref: (TILE_N, 1) i32 in VMEM
    # out_ref:    (1, 1) f32 in VMEM, resident across the grid (accumulator)
    i = pl.program_id(0)

    @pl.when(i == 0)
    def _init():
        out_ref[...] = jnp.zeros_like(out_ref)

    x = logits_ref[...].astype(jnp.float32)                   # (TILE_N, C)
    lbl = labels_ref[...]                                     # (TILE_N, 1) i32

    # Unnormalized softmax pieces over the class axis (dim=1 in PyTorch).
    m = jnp.max(x, axis=1, keepdims=True)                     # (TILE_N, 1)
    e = jnp.exp(x - m)                                        # (TILE_N, C)
    denom = jnp.sum(e, axis=1, keepdims=True)                 # (TILE_N, 1)

    # Gather the label column of `e` with a masked reduce (no one-hot multiply,
    # no full-width normalization).
    cls = jax.lax.broadcasted_iota(jnp.int32, x.shape, 1)     # (TILE_N, C)
    e_y = jnp.sum(jnp.where(cls == lbl, e, 0.0), axis=1, keepdims=True)
    p_y = e_y * pl.reciprocal(denom, approx=False)            # (TILE_N, 1) only

    # A = alpha / (alpha - 1);  per-row value A * (1 - P_y ** (1/A)).
    a = alpha / (alpha - 1.0)
    inv_a = 1.0 / a
    if inv_a == 0.5:                                          # alpha == 2 fast path
        root = jnp.sqrt(p_y)
    else:
        root = jnp.exp(inv_a * jnp.log(p_y))                  # p_y > 0 always
    vals = a * (1.0 - root)                                   # (TILE_N, 1)

    # Mask rows past the true batch size (padded tail of the last tile).
    rows = jax.lax.broadcasted_iota(jnp.int32, (tile_n, 1), 0) + i * tile_n
    vals = jnp.where(rows < n_valid, vals, 0.0)

    out_ref[...] += jnp.sum(vals, axis=0, keepdims=True)      # running sum

    @pl.when(i == pl.num_programs(0) - 1)
    def _finalize():
        out_ref[...] = out_ref[...] * (1.0 / float(n_valid))  # mean over true N


def _choose_tile_n(n, c, itemsize):
    """Largest batch tile (multiple of 8) whose input block stays ~2 MiB."""
    budget_bytes = 2 * 1024 * 1024
    t = budget_bytes // max(1, c * itemsize)
    t = max(8, min(512, (t // 8) * 8))
    n_pad8 = ((n + 7) // 8) * 8
    return max(8, min(t, n_pad8))


def alpha_loss(logits, labels, alpha):
    """AlphaLoss forward.  logits: float[N, C], labels: int[N] -> f32 scalar."""
    alpha = float(alpha)
    if alpha == 1.0:
        raise ValueError("alpha == 1 makes A = alpha/(alpha-1) undefined")

    n, c = logits.shape
    labels2d = labels.astype(jnp.int32).reshape(n, 1)
    itemsize = jnp.dtype(logits.dtype).itemsize

    tile_n = _choose_tile_n(n, c, itemsize)
    n_pad = pl.cdiv(n, tile_n) * tile_n
    if n_pad != n:
        logits = jnp.pad(logits, ((0, n_pad - n), (0, 0)))
        labels2d = jnp.pad(labels2d, ((0, n_pad - n), (0, 0)))

    grid = (n_pad // tile_n,)
    kernel = functools.partial(
        _alpha_loss_kernel, alpha=alpha, n_valid=n, tile_n=tile_n
    )

    cost = pl.CostEstimate(
        flops=5 * n * c,
        transcendentals=n * c + 2 * n,
        bytes_accessed=n * c * itemsize + n * 4 + 4,
    )

    out = pl.pallas_call(
        kernel,
        out_shape=jax.ShapeDtypeStruct((1, 1), jnp.float32),
        grid_spec=pltpu.PrefetchScalarGridSpec(
            num_scalar_prefetch=0,
            grid=grid,
            in_specs=[
                pl.BlockSpec((tile_n, c), lambda i: (i, 0)),
                pl.BlockSpec((tile_n, 1), lambda i: (i, 0)),
            ],
            out_specs=pl.BlockSpec((1, 1), lambda i: (0, 0)),
        ),
        compiler_params=pltpu.CompilerParams(
            dimension_semantics=("arbitrary",),       # resident accumulator axis
            vmem_limit_bytes=32 * 1024 * 1024,
        ),
        cost_estimate=cost,
    )(logits, labels2d)
    return out[0, 0]


def _reference(logits, labels, alpha):
    probs = jax.nn.softmax(logits.astype(jnp.float32), axis=1)
    p_y = jnp.take_along_axis(probs, labels[:, None], axis=1)[:, 0]
    a = alpha / (alpha - 1.0)
    return jnp.mean(a * (1.0 - p_y ** (1.0 / a)))


if __name__ == "__main__":
    key = jax.random.PRNGKey(0)

    # Case 1: alpha == 2 (sqrt fast path), exact tile fit.
    k1, k2, k3, k4 = jax.random.split(key, 4)
    n1, c1, alpha1 = 8, 16, 2.0
    logits1 = jax.random.normal(k1, (n1, c1), dtype=jnp.float32)
    labels1 = jax.random.randint(k2, (n1,), 0, c1, dtype=jnp.int32)
    loss1 = alpha_loss(logits1, labels1, alpha1)
    jax.block_until_ready(loss1)
    ref1 = _reference(logits1, labels1, alpha1)
    assert jnp.allclose(loss1, ref1, atol=1e-5, rtol=1e-5), (loss1, ref1)

    # Case 2: alpha != 2 (general exp/log path) and a batch that needs padding/masking.
    n2, c2, alpha2 = 10, 16, 3.0
    logits2 = jax.random.normal(k3, (n2, c2), dtype=jnp.float32)
    labels2 = jax.random.randint(k4, (n2,), 0, c2, dtype=jnp.int32)
    loss2 = alpha_loss(logits2, labels2, alpha2)
    jax.block_until_ready(loss2)
    ref2 = _reference(logits2, labels2, alpha2)
    assert jnp.allclose(loss2, ref2, atol=1e-5, rtol=1e-5), (loss2, ref2)

    print("KERNEL_OK")
</pallas_src>

<mosaic_0001>
module attributes {stable_mosaic.version = 11 : i64} {
  func.func @_alpha_loss_kernel(%arg0: i32, %arg1: memref<8x16xf32, #tpu.memory_space<vmem>>, %arg2: memref<8x1xi32, #tpu.memory_space<vmem>>, %arg3: memref<1x1xf32, #tpu.memory_space<vmem>>) attributes {dimension_semantics = [#tpu.dimension_semantics<arbitrary>], iteration_bounds = array<i64: 1>, scalar_prefetch = 0 : i64, scratch_operands = 0 : i64, tpu.core_type = #tpu.core_type<tc>, window_params = [{transform_indices = @transform_0, window_bounds = array<i64: 8, 16>}, {transform_indices = @transform_1, window_bounds = array<i64: 8, 1>}, {pipeline_mode = #tpu.pipeline_mode<synchronous>, transform_indices = @transform_2, window_bounds = array<i64: 1, 1>}]} {
    %c0_i32 = arith.constant 0 : i32
    %0 = arith.cmpi eq, %arg0, %c0_i32 : i32
    %1 = arith.extui %0 : i1 to i32
    %c0_i32_0 = arith.constant 0 : i32
    %2 = arith.cmpi ne, %1, %c0_i32_0 : i32
    scf.if %2 {
      %cst_18 = arith.constant 0.000000e+00 : f32
      %42 = vector.broadcast %cst_18 : f32 to vector<1x1xf32>
      %c0_19 = arith.constant 0 : index
      %c0_20 = arith.constant 0 : index
      %43 = vector.load %arg3[%c0_19, %c0_20] : memref<1x1xf32, #tpu.memory_space<vmem>>, vector<1x1xf32>
      tpu.vector_store %arg3[%c0_19, %c0_20], %42 {strides = array<i32>} : memref<1x1xf32, #tpu.memory_space<vmem>>, vector<1x1xf32>,
    } else {
    }
    %c0 = arith.constant 0 : index
    %c0_1 = arith.constant 0 : index
    %3 = vector.load %arg1[%c0, %c0_1] : memref<8x16xf32, #tpu.memory_space<vmem>>, vector<8x16xf32>
    %c0_2 = arith.constant 0 : index
    %c0_3 = arith.constant 0 : index
    %4 = vector.load %arg2[%c0_2, %c0_3] : memref<8x1xi32, #tpu.memory_space<vmem>>, vector<8x1xi32>
    %cst = arith.constant dense<0xFF800000> : vector<8xf32>
    %5 = vector.multi_reduction <maximumf>, %3, %cst [1] : vector<8x16xf32> to vector<8xf32>
    %6 = vector.shape_cast %5 : vector<8xf32> to vector<8x1xf32>
    %7 = vector.broadcast %6 : vector<8x1xf32> to vector<8x16xf32>
    %8 = arith.subf %3, %7 : vector<8x16xf32>
    %9 = math.exp %8 : vector<8x16xf32>
    %cst_4 = arith.constant dense<0.000000e+00> : vector<8xf32>
    %10 = vector.multi_reduction <add>, %9, %cst_4 [1] : vector<8x16xf32> to vector<8xf32>
    %11 = vector.shape_cast %10 : vector<8xf32> to vector<8x1xf32>
    %12 = tpu.iota {dimensions = array<i32: 1>} : vector<8x16xi32>
    %13 = vector.broadcast %4 : vector<8x1xi32> to vector<8x16xi32>
    %14 = arith.cmpi eq, %12, %13 : vector<8x16xi32>
    %cst_5 = arith.constant 0.000000e+00 : f32
    %15 = vector.broadcast %cst_5 : f32 to vector<8x16xf32>
    %16 = arith.select %14, %9, %15 : vector<8x16xi1>, vector<8x16xf32>
    %cst_6 = arith.constant dense<0.000000e+00> : vector<8xf32>
    %17 = vector.multi_reduction <add>, %16, %cst_6 [1] : vector<8x16xf32> to vector<8xf32>
    %18 = vector.shape_cast %17 : vector<8xf32> to vector<8x1xf32>
    %19 = tpu.reciprocal %11 : vector<8x1xf32> -> vector<8x1xf32>
    %20 = arith.mulf %18, %19 : vector<8x1xf32>
    %21 = math.sqrt %20 : vector<8x1xf32>
    %cst_7 = arith.constant 1.000000e+00 : f32
    %22 = vector.broadcast %cst_7 : f32 to vector<8x1xf32>
    %23 = arith.subf %22, %21 : vector<8x1xf32>
    %cst_8 = arith.constant 2.000000e+00 : f32
    %24 = vector.broadcast %cst_8 : f32 to vector<8x1xf32>
    %25 = arith.mulf %24, %23 : vector<8x1xf32>
    %26 = tpu.iota {dimensions = array<i32: 0>} : vector<8x1xi32>
    %c8_i32 = arith.constant 8 : i32
    %27 = arith.muli %arg0, %c8_i32 : i32
    %28 = vector.broadcast %27 : i32 to vector<8x1xi32>
    %29 = arith.addi %26, %28 : vector<8x1xi32>
    %c8_i32_9 = arith.constant 8 : i32
    %30 = vector.broadcast %c8_i32_9 : i32 to vector<8x1xi32>
    %31 = arith.cmpi slt, %29, %30 : vector<8x1xi32>
    %cst_10 = arith.constant 0.000000e+00 : f32
    %32 = vector.broadcast %cst_10 : f32 to vector<8x1xf32>
    %33 = arith.select %31, %25, %32 : vector<8x1xi1>, vector<8x1xf32>
    %c0_11 = arith.constant 0 : index
    %c0_12 = arith.constant 0 : index
    %34 = vector.load %arg3[%c0_11, %c0_12] : memref<1x1xf32, #tpu.memory_space<vmem>>, vector<1x1xf32>
    %cst_13 = arith.constant dense<0.000000e+00> : vector<1xf32>
    %35 = vector.multi_reduction <add>, %33, %cst_13 [0] : vector<8x1xf32> to vector<1xf32>
    %36 = vector.shape_cast %35 : vector<1xf32> to vector<1x1xf32>
    %37 = arith.addf %34, %36 : vector<1x1xf32>
    %c0_14 = arith.constant 0 : index
    %c0_15 = arith.constant 0 : index
    %38 = vector.load %arg3[%c0_14, %c0_15] : memref<1x1xf32, #tpu.memory_space<vmem>>, vector<1x1xf32>
    tpu.vector_store %arg3[%c0_14, %c0_15], %37 {strides = array<i32>} : memref<1x1xf32, #tpu.memory_space<vmem>>, vector<1x1xf32>,
    %c0_i32_16 = arith.constant 0 : i32
    %39 = arith.cmpi eq, %arg0, %c0_i32_16 : i32
    %40 = arith.extui %39 : i1 to i32
    %c0_i32_17 = arith.constant 0 : i32
    %41 = arith.cmpi ne, %40, %c0_i32_17 : i32
    scf.if %41 {
      %c0_18 = arith.constant 0 : index
      %c0_19 = arith.constant 0 : index
      %42 = vector.load %arg3[%c0_18, %c0_19] : memref<1x1xf32, #tpu.memory_space<vmem>>, vector<1x1xf32>
      %cst_20 = arith.constant 1.250000e-01 : f32
      %43 = vector.broadcast %cst_20 : f32 to vector<1x1xf32>
      %44 = arith.mulf %42, %43 : vector<1x1xf32>
      %c0_21 = arith.constant 0 : index
      %c0_22 = arith.constant 0 : index
      %45 = vector.load %arg3[%c0_21, %c0_22] : memref<1x1xf32, #tpu.memory_space<vmem>>, vector<1x1xf32>
      tpu.vector_store %arg3[%c0_21, %c0_22], %44 {strides = array<i32>} : memref<1x1xf32, #tpu.memory_space<vmem>>, vector<1x1xf32>,
    } else {
    }
    return
  }
  func.func @transform_0(%arg0: i32) -> (i32, i32) {
    %c0_i32 = arith.constant 0 : i32
    %c0_i32_0 = arith.constant 0 : i32
    return %arg0, %c0_i32 : i32, i32
  }
  func.func @transform_1(%arg0: i32) -> (i32, i32) {
    %c0_i32 = arith.constant 0 : i32
    %c0_i32_0 = arith.constant 0 : i32
    return %arg0, %c0_i32 : i32, i32
  }
  func.func @transform_2(%arg0: i32) -> (i32, i32) {
    %c0_i32 = arith.constant 0 : i32
    %c0_i32_0 = arith.constant 0 : i32
    %c0_i32_1 = arith.constant 0 : i32
    return %c0_i32, %c0_i32_0 : i32, i32
  }
}

</mosaic_0001>

<bundles_post_ra>
// kernel: tpu_custom_call.1
= control target key start
LH: loop header
LB: loop body
LE: loop exit
PB: predicated region body
PF: predicated region fallthrough
CT: control target
= control target key end

     0   :  { %vm20_vm0 = vcmask 130048   ;;  %s153_s0 = inlined_call_operand.vmem [shape: f32[8,16], index: 0, kind: input, shape index: {}]   ;;  %s154_s1 = inlined_call_operand.vmem [shape: s32[8,1], index: 1, kind: input, shape index: {}]   ;;  %s155_s2 = inlined_call_operand.hbm [shape: f32[1,1], index: 2, kind: output, shape index: {}]  }
   0x1   :  { %v18_v0 = vld [vmem:[%s153_s0] sm:$0xff] }
   0x2   :  { %7 = vsyncpa [#allocation3], 0  ;;  %v21_v1 = vsel %vm20_vm0, %v18_v0, -inf  ;;  %v120_v2 = vmov 0   ;;  %v19_v3 = vld [vmem:[%s154_s1] sm:$0xff]  ;;  %v30_v7 = vlaneseq  ;;  %vm16_vm2 = vcmask 0  }
   0x3   :  { %91 = vset.pattern.permute.xlu0 %v120_v2  ;;  %v121_v14 = vmov 0.0   ;;  %s122_s0 = smov [#allocation2]  }
   0x4   :  { %22 = vmax.xlane.f32.xlu0 %v21_v1  ;;  %v31_v8 = vand.u32 127, %v30_v7  ;;  %17 = vst.msk [vmem:[#allocation2] sm:$0x1] %vm16_vm2, %v121_v14  ;;  %s80_s1 = sshll.u32 %s122_s0, 4  ;;  %s81_s1 = int_to_ptr.vmem [resolvable:$true] %s80_s1 }
   0x5   :  { %s98_s13 = scalar_lea.vmem %s81_s1, 16  ;;  %s102_s14 = scalar_lea.vmem %s81_s1, 32 }
   0x6   :  { %p99_p0 = scmp.ne.s32.totalorder %s81_s1, %s98_s13  ;;  %p103_p1 = scmp.lt.s32.totalorder %s81_s1, %s81_s1 }
   0x7   :  { %p104_p2 = scmp.lt.s32.totalorder %s102_s14, %s98_s13 }
   0x9   :  { %p105_p3 = por %p104_p2, %p103_p1 }
   0xb   :  { %v58_v31 = vld [vmem:[#allocation2] sm:$0x1]  ;;  %p106_p4 = pnand %p105_p3, %p99_p0 }
  0x1a   :  { %33 = vperm.xlu0 %91, %v19_v3  }
  0x8d   :  { %v23_v4 = vpop.xlane.xlu0 %22 }
  0x8e   :  { %v24_v5 = vsub.f32 %v18_v0, %v23_v4 }
  0x90   :  { %v25_v6 = vmul.f32 1.442695, %v24_v5 }
  0x92   :  { %92 = vpow2.f32 %v25_v6 }
  0x95   :  { %v34_v9 = vpop.permute.xlu0 %33 }
  0x96   :  { %vm35_vm1 = vcmp.eq.s32.totalorder %v31_v8, %v34_v9 }
  0x9f   :  { %v93_v10 = vpop.eup %92 }
  0xa0   :  { %v27_v11 = vsel %vm20_vm0, %v93_v10, 0.0  ;;  %v36_v12 = vsel %vm35_vm1, %v93_v10, 0.0 }
  0xa1   :  { %28 = vadd.xlane.f32.xlu1 %v27_v11  ;;  %v37_v13 = vsel %vm20_vm0, %v36_v12, 0.0 }
  0xa5   :  { %38 = vadd.xlane.f32.xlu1 %v37_v13 }
 0x12a   :  { %v29_v15 = vpop.xlane.xlu1 %28 }
 0x12b   :  { %94 = vrcp.f32 %v29_v15 }
 0x12e   :  { %v39_v17 = vpop.xlane.xlu1 %38 }
 0x138   :  { %v95_v16 = vpop.eup %94 }
 0x139   :  { %v41_v18 = vmul.f32 %v95_v16, %v39_v17 }
 0x13b   :  { %96 = vrsqrt.f32 %v41_v18  ;;  %vm44_vm3 = vcmp.eq.f32.partialorder %v41_v18, inf  ;;  %v47_v21 = vand.u32 2147483648, %v41_v18  ;;  %vm46_vm4 = vcmp.eq.f32.partialorder %v41_v18, 0.0 }
 0x148   :  { %v97_v19 = vpop.eup %96 }
 0x149   :  { %v43_v20 = vmul.f32 %v97_v19, %v41_v18 }
 0x14b   :  { %v45_v22 = vsel %vm44_vm3, %v41_v18, %v43_v20 }
 0x14c   :  { %v48_v23 = vsel %vm46_vm4, %v47_v21, %v45_v22 }
 0x14d   :  { %v49_v24 = vsub.f32 1.0, %v48_v23 }
 0x14f   :  { %v50_v25 = vmul.f32 2.0, %v49_v24 }
 0x151   :  { %v59_v26 = vrot.slane %v50_v25, 4 }
 0x153   :  { %v60_v27 = vadd.f32 %v59_v26, %v50_v25 }
 0x155   :  { %v61_v28 = vrot.slane %v60_v27, 2 }
 0x157   :  { %v62_v29 = vadd.f32 %v61_v28, %v60_v27 }
 0x159   :  { %v63_v30 = vrot.slane %v62_v29, 1 }
 0x15b   :  { %v64_v32 = vadd.f32 %v63_v30, %v62_v29 }
 0x15d   :  { %v65_v33 = vadd.f32 %v64_v32, %v58_v31 }
 0x15f   :  { %67 = vst.msk [vmem:[#allocation2] sm:$0x1] %vm16_vm2, %v65_v33 }
 0x166   :  { %v71_v34 = vld [vmem:[#allocation2] sm:$0x1] }
 0x167   :  { %v72_v35 = vmul.f32 0.125, %v71_v34 }
 0x169   :  { %73 = vst.msk [vmem:[#allocation2] sm:$0x1] %vm16_vm2, %v72_v35 }
 0x16a   :  { %109 = shalt.err (!%p106_p4)
}
 0x16b   :  { %83 = dma.vmem_to_hbm [thread:$0]  %s81_s1, 16, %s155_s2, [#allocation3]  }
 0x16c   :  { %118 = dma.done.wait [#allocation3], 16  }
 0x16d   :  { %119 = vsyncadd [#allocation3], 4294967280 }
 0x16e   :  { %87 = vsyncpa [#allocation3], 1 }

</bundles_post_ra>
